<compile_context>
chip_gen: v7x
topology: tpu7x:2x2x1
jax: 0.10.0
libtpu: 0.0.40
codegen_flags: <defaults>
</compile_context>

<pallas_src>
import jax
import jax.numpy as jnp
from jax.experimental import pallas as pl
from jax.experimental.pallas import tpu as pltpu


# ----------------------------------------------------------------------------
# Tiling helpers
# ----------------------------------------------------------------------------
def _tile(dim: int, target: int) -> int:
    """Largest tile <= target that evenly divides dim (power-of-two descent)."""
    if dim <= target:
        return dim
    t = target
    while dim % t:
        t //= 2
        if t < 1:
            return dim
    return t


def _pad_rows(x, mult):
    m = x.shape[0]
    m_pad = ((m + mult - 1) // mult) * mult
    if m_pad == m:
        return x
    return jnp.pad(x, ((0, m_pad - m), (0, 0)))


def _chip_config():
    """Per-generation (tm, tn, tk) tile targets and VMEM budget (bytes)."""
    kind = ""
    try:
        kind = jax.devices()[0].device_kind.lower()
    except Exception:
        pass
    cap = None
    try:
        cap = int(pltpu.get_tpu_info().vmem_capacity_bytes)
    except Exception:
        cap = None
    if "v7" in kind:
        # 64 MiB physical VMEM, 3.2 TB/s HBM -> smaller optimal tile, leave XLA headroom.
        tm, tn, tk = 1024, 1024, 512
        budget = int((cap or 64 * 2**20) * 0.70)
    elif "v6" in kind:
        # ~680 flop/byte roofline crossover -> 1024x2048 tiles (~683 flop/byte).
        tm, tn, tk = 1024, 2048, 512
        budget = int((cap or 128 * 2**20) * 0.75)
    elif "v5" in kind:
        tm, tn, tk = 1024, 1024, 512
        budget = int((cap or 128 * 2**20) * 0.75)
    else:
        tm, tn, tk = 512, 1024, 512
        budget = int((cap or 64 * 2**20) * 0.70)
    return tm, tn, tk, budget


def _clamp_tiles(tm, tn, tk, budget, full_out, out_itemsize):
    """Shrink tile targets until the (double-buffered) VMEM estimate fits the budget."""
    def est(tm_, tn_, tk_):
        a = 2 * tm_ * tk_ * 2                      # x blocks   (bf16, double buffered)
        b = 2 * tk_ * tn_ * 2                      # W blocks   (bf16, double buffered)
        vecs = 4 * tn_ * 4                         # b_lm / w_head row blocks (f32)
        out_cols = tn_ if full_out else 1
        out = 2 * tm_ * out_cols * out_itemsize    # output block (double buffered)
        acc = tm_ * tn_ * 4                        # f32 accumulator scratch
        return a + b + vecs + out + acc

    for _ in range(16):
        if est(tm, tn, tk) <= budget:
            break
        if tn > 512:
            tn //= 2
        elif tm > 512:
            tm //= 2
        elif tk > 256:
            tk //= 2
        else:
            break
    return tm, tn, tk


# ----------------------------------------------------------------------------
# Kernel 1 (fast path): fused last-token hidden projection + reward head.
#   out[i] = sum_n( tanh( sum_k x[i,k] W[k,n] + b_lm[n] ) * w_head[n] ) + b_head
# Grid (M//tm, N//tn, K//tk); out block is resident across the N and K reduction axes.
# ----------------------------------------------------------------------------
def _fused_reward_kernel(x_ref, w_ref, blm_ref, whead_ref, bhead_ref, out_ref, acc_ref):
    j = pl.program_id(1)
    k = pl.program_id(2)

    @pl.when(jnp.logical_and(j == 0, k == 0))
    def _():
        out_ref[...] = jnp.zeros_like(out_ref) + bhead_ref[0]

    @pl.when(k == 0)
    def _():
        acc_ref[...] = jnp.zeros_like(acc_ref)

    # bf16 x bf16 on the MXU, f32 accumulation.
    acc_ref[...] += jnp.dot(x_ref[...], w_ref[...], preferred_element_type=jnp.float32)

    @pl.when(k == pl.num_programs(2) - 1)
    def _():
        h = jnp.tanh(acc_ref[...] + blm_ref[...])                       # [tm, tn] f32
        # Linear(H, 1): VPU multiply + lane reduce (no 1-wide MXU matmul).
        out_ref[...] += jnp.sum(h * whead_ref[...], axis=-1, keepdims=True)


def fused_last_token_reward(x_bf16, w_lm_bf16, b_lm, w_head, b_head):
    m, k = x_bf16.shape
    k2, n = w_lm_bf16.shape
    assert k == k2 and w_head.shape == (1, n)
    tm_t, tn_t, tk_t, budget = _chip_config()
    tm_t, tn_t, tk_t = _clamp_tiles(tm_t, tn_t, tk_t, budget, full_out=False, out_itemsize=4)
    tm, tn, tk = _tile(m, tm_t), _tile(n, tn_t), _tile(k, tk_t)
    grid = (m // tm, n // tn, k // tk)   # reductions (N for head, K for matmul) last
    return pl.pallas_call(
        _fused_reward_kernel,
        out_shape=jax.ShapeDtypeStruct((m, 1), jnp.float32),
        grid_spec=pltpu.PrefetchScalarGridSpec(
            num_scalar_prefetch=0,
            grid=grid,
            in_specs=[
                pl.BlockSpec((tm, tk), lambda i, j, kk: (i, kk)),          # x     (bf16)
                pl.BlockSpec((tk, tn), lambda i, j, kk: (kk, j)),          # W_lm  (bf16)
                pl.BlockSpec((1, tn), lambda i, j, kk: (0, j)),            # b_lm  (f32)
                pl.BlockSpec((1, tn), lambda i, j, kk: (0, j)),            # w_head(f32)
                pl.BlockSpec(memory_space=pltpu.MemorySpace.SMEM),         # b_head scalar
            ],
            out_specs=pl.BlockSpec((tm, 1), lambda i, j, kk: (i, 0)),
            scratch_shapes=[pltpu.VMEM((tm, tn), jnp.float32)],
        ),
        compiler_params=pltpu.CompilerParams(
            dimension_semantics=("parallel", "arbitrary", "arbitrary"),
            vmem_limit_bytes=budget,
        ),
    )(x_bf16, w_lm_bf16, b_lm, w_head, b_head)


# ----------------------------------------------------------------------------
# Kernel 2 (fallback "real LM" path): full-sequence hidden projection.
#   last_hidden_state = tanh(emb @ W_lm + b_lm), emitted as bf16.
# TODO(synk): the real pretrained causal-LM forward (attention stack, rotary, 4-bit
# quantized weights) has no Pallas equivalent here; this dense tanh projection is a
# deterministic synthetic stand-in producing a [B*S, H] last_hidden_state.
# ----------------------------------------------------------------------------
def _matmul_tanh_kernel(x_ref, w_ref, b_ref, out_ref, acc_ref):
    k = pl.program_id(2)

    @pl.when(k == 0)
    def _():
        acc_ref[...] = jnp.zeros_like(acc_ref)

    acc_ref[...] += jnp.dot(x_ref[...], w_ref[...], preferred_element_type=jnp.float32)

    @pl.when(k == pl.num_programs(2) - 1)
    def _():
        out_ref[...] = jnp.tanh(acc_ref[...] + b_ref[...]).astype(out_ref.dtype)


def lm_hidden_full(emb_flat_bf16, w_lm_bf16, b_lm):
    m, k = emb_flat_bf16.shape
    k2, n = w_lm_bf16.shape
    assert k == k2
    tm_t, tn_t, tk_t, budget = _chip_config()
    tm_t, tn_t, tk_t = _clamp_tiles(tm_t, tn_t, tk_t, budget, full_out=True, out_itemsize=2)
    tm, tn, tk = _tile(m, tm_t), _tile(n, tn_t), _tile(k, tk_t)
    grid = (m // tm, n // tn, k // tk)   # reduction (K) last
    return pl.pallas_call(
        _matmul_tanh_kernel,
        out_shape=jax.ShapeDtypeStruct((m, n), jnp.bfloat16),   # bf16 writeback (half HBM)
        grid_spec=pltpu.PrefetchScalarGridSpec(
            num_scalar_prefetch=0,
            grid=grid,
            in_specs=[
                pl.BlockSpec((tm, tk), lambda i, j, kk: (i, kk)),   # emb  (bf16)
                pl.BlockSpec((tk, tn), lambda i, j, kk: (kk, j)),   # W_lm (bf16)
                pl.BlockSpec((1, tn), lambda i, j, kk: (0, j)),     # b_lm (f32)
            ],
            out_specs=pl.BlockSpec((tm, tn), lambda i, j, kk: (i, j)),
            scratch_shapes=[pltpu.VMEM((tm, tn), jnp.float32)],
        ),
        compiler_params=pltpu.CompilerParams(
            dimension_semantics=("parallel", "parallel", "arbitrary"),
            vmem_limit_bytes=budget,
        ),
    )(emb_flat_bf16, w_lm_bf16, b_lm)


# ----------------------------------------------------------------------------
# RewardModel forward (glue + Pallas kernels)
# ----------------------------------------------------------------------------
def reward_model_forward(params, input_ids, attention_mask=None, use_full_sequence=False):
    b, s = input_ids.shape
    h = params["w_lm"].shape[0]

    # Hoisted sequence-length computation (left-aligned mask, as in the PyTorch original).
    # mask.sum()==0 maps to S-1, matching PyTorch's -1 indexing.
    if attention_mask is None:
        seq_lengths = jnp.full((b,), s - 1, dtype=jnp.int32)
    else:
        lengths = jnp.sum(attention_mask.astype(jnp.int32), axis=1)
        seq_lengths = jnp.where(lengths > 0, lengths - 1, s - 1).astype(jnp.int32)

    if use_full_sequence:
        # "Real LM" fallback: compute full-sequence hidden states (as a pretrained causal
        # LM with attention would require), then gather the last valid token per row.
        # TODO(synk): fuse the embedding gather into lm_hidden_full via scalar-prefetched
        # input_ids + data-dependent index_map instead of materializing emb in HBM.
        emb = params["embedding"][input_ids].reshape(b * s, h)          # [B*S, H] bf16
        hs = lm_hidden_full(_pad_rows(emb, 16), params["w_lm"], params["b_lm"])
        hs = hs[: b * s].reshape(b, s, h)                               # bf16 hidden states
        last = hs[jnp.arange(b), seq_lengths].astype(jnp.float32)       # [B, H]
        return last @ params["w_head"].T + params["b_head"]             # tiny glue head

    # Fast path: the stand-in base model has no cross-token mixing and only the last valid
    # token feeds the head, so compute hidden states only for those B rows (S x less work).
    last_ids = input_ids[jnp.arange(b), seq_lengths]                    # [B]
    last_emb = params["embedding"][last_ids]                            # [B, H] bf16 gather
    reward = fused_last_token_reward(
        _pad_rows(last_emb, 16),                                        # sublane-aligned M
        params["w_lm"], params["b_lm"], params["w_head"], params["b_head"],
    )
    return reward[:b]                                                    # logits: [B, 1]


def init_params(key, vocab_size, hidden_size):
    k1, k2, k3 = jax.random.split(key, 3)
    return {
        # Pre-cast MXU operands to bf16 once here (not per forward call).
        "embedding": (jax.random.normal(k1, (vocab_size, hidden_size), jnp.float32)
                      * 0.25).astype(jnp.bfloat16),
        "w_lm": (jax.random.normal(k2, (hidden_size, hidden_size), jnp.float32)
                 * 0.25).astype(jnp.bfloat16),
        "b_lm": jax.random.normal(k3, (1, hidden_size), jnp.float32) * 0.1,
        # reward_head: nn.init.zeros_ on both weight and bias (per module __init__);
        # nn.Linear(H, 1).weight has shape (1, H).
        "w_head": jnp.zeros((1, hidden_size), jnp.float32),
        "b_head": jnp.zeros((1,), jnp.float32),
    }


def reward_model_reference(params, input_ids, attention_mask):
    """Pure-JAX reference (f32 math from the same bf16 operands)."""
    b, s = input_ids.shape
    emb = params["embedding"][input_ids].astype(jnp.float32)
    w = params["w_lm"].astype(jnp.float32)
    hs = jnp.tanh(emb @ w + params["b_lm"])
    lengths = jnp.sum(attention_mask.astype(jnp.int32), axis=1)
    seq = jnp.where(lengths > 0, lengths - 1, s - 1)
    last = hs[jnp.arange(b), seq]                                        # [B, H]
    return jnp.sum(last * params["w_head"], axis=-1, keepdims=True) + params["b_head"]


if __name__ == "__main__":
    B, S, H, VOCAB = 2, 8, 32, 50
    key = jax.random.PRNGKey(0)
    kp, ki, kw, kb = jax.random.split(key, 4)

    params = init_params(kp, VOCAB, H)
    input_ids = jax.random.randint(ki, (B, S), 0, VOCAB, dtype=jnp.int32)
    # variable-length attention masks (lengths 8 and 5)
    lengths = jnp.array([8, 5], dtype=jnp.int32)
    attention_mask = (
        jax.lax.broadcasted_iota(jnp.int32, (B, S), 1) < lengths[:, None]
    ).astype(jnp.int32)

    # 1) Module spec: zero-initialized reward head -> logits must be exactly zero.
    reward = jax.block_until_ready(reward_model_forward(params, input_ids, attention_mask))
    assert reward.shape == (B, 1)
    assert bool(jnp.all(reward == 0.0))

    # 2) Non-zero head: fused fast path vs pure-JAX reference.
    params_nz = dict(params)
    params_nz["w_head"] = jax.random.normal(kw, (1, H), jnp.float32) * 0.1
    params_nz["b_head"] = jax.random.normal(kb, (1,), jnp.float32) * 0.1
    want = reward_model_reference(params_nz, input_ids, attention_mask)
    got_fast = jax.block_until_ready(
        reward_model_forward(params_nz, input_ids, attention_mask))
    assert jnp.allclose(got_fast, want, rtol=1e-2, atol=1e-3), (got_fast, want)

    # 3) Full-sequence "real LM" fallback path (bf16 hidden states) agrees too.
    got_full = jax.block_until_ready(
        reward_model_forward(params_nz, input_ids, attention_mask, use_full_sequence=True))
    assert jnp.allclose(got_full, want, rtol=5e-2, atol=5e-3), (got_full, want)

    # 4) attention_mask=None -> last position semantics.
    mask_all = jnp.ones((B, S), jnp.int32)
    want_none = reward_model_reference(params_nz, input_ids, mask_all)
    got_none = jax.block_until_ready(reward_model_forward(params_nz, input_ids, None))
    assert jnp.allclose(got_none, want_none, rtol=1e-2, atol=1e-3), (got_none, want_none)

    print("KERNEL_OK")
</pallas_src>

<mosaic_0001>
module attributes {stable_mosaic.version = 11 : i64} {
  func.func @_fused_reward_kernel(%arg0: i32, %arg1: i32, %arg2: i32, %arg3: memref<16x32xbf16, #tpu.memory_space<vmem>>, %arg4: memref<32x32xbf16, #tpu.memory_space<vmem>>, %arg5: memref<1x32xf32, #tpu.memory_space<vmem>>, %arg6: memref<1x32xf32, #tpu.memory_space<vmem>>, %arg7: memref<1xf32, #tpu.memory_space<smem>>, %arg8: memref<16x1xf32, #tpu.memory_space<vmem>>, %arg9: memref<16x32xf32, #tpu.memory_space<vmem>>) attributes {dimension_semantics = [#tpu.dimension_semantics<parallel>, #tpu.dimension_semantics<arbitrary>, #tpu.dimension_semantics<arbitrary>], iteration_bounds = array<i64: 1, 1, 1>, scalar_prefetch = 0 : i64, scratch_operands = 1 : i64, tpu.core_type = #tpu.core_type<tc>, window_params = [{transform_indices = @transform_0, window_bounds = array<i64: 16, 32>}, {transform_indices = @transform_1, window_bounds = array<i64: 32, 32>}, {transform_indices = @transform_2, window_bounds = array<i64: 1, 32>}, {transform_indices = @transform_3, window_bounds = array<i64: 1, 32>}, {transform_indices = @transform_4, window_bounds = array<i64: 1>}, {transform_indices = @transform_5, window_bounds = array<i64: 16, 1>}]} {
    %c0_i32 = arith.constant 0 : i32
    %0 = arith.cmpi eq, %arg1, %c0_i32 : i32
    %c0_i32_0 = arith.constant 0 : i32
    %1 = arith.cmpi eq, %arg2, %c0_i32_0 : i32
    %2 = arith.andi %0, %1 : i1
    %3 = arith.extui %2 : i1 to i32
    %c0_i32_1 = arith.constant 0 : i32
    %4 = arith.cmpi ne, %3, %c0_i32_1 : i32
    scf.if %4 {
      %cst_13 = arith.constant 0.000000e+00 : f32
      %17 = vector.broadcast %cst_13 : f32 to vector<16x1xf32>
      %c0_14 = arith.constant 0 : index
      %18 = memref.load %arg7[%c0_14] : memref<1xf32, #tpu.memory_space<smem>>
      %19 = vector.broadcast %18 : f32 to vector<16x1xf32>
      %20 = arith.addf %17, %19 : vector<16x1xf32>
      %c0_15 = arith.constant 0 : index
      %c0_16 = arith.constant 0 : index
      %21 = vector.load %arg8[%c0_15, %c0_16] : memref<16x1xf32, #tpu.memory_space<vmem>>, vector<16x1xf32>
      tpu.vector_store %arg8[%c0_15, %c0_16], %20 {strides = array<i32>} : memref<16x1xf32, #tpu.memory_space<vmem>>, vector<16x1xf32>,
    } else {
    }
    %c0_i32_2 = arith.constant 0 : i32
    %5 = arith.cmpi eq, %arg2, %c0_i32_2 : i32
    %6 = arith.extui %5 : i1 to i32
    %c0_i32_3 = arith.constant 0 : i32
    %7 = arith.cmpi ne, %6, %c0_i32_3 : i32
    scf.if %7 {
      %cst_13 = arith.constant 0.000000e+00 : f32
      %17 = vector.broadcast %cst_13 : f32 to vector<16x32xf32>
      %c0_14 = arith.constant 0 : index
      %c0_15 = arith.constant 0 : index
      %18 = vector.load %arg9[%c0_14, %c0_15] : memref<16x32xf32, #tpu.memory_space<vmem>>, vector<16x32xf32>
      tpu.vector_store %arg9[%c0_14, %c0_15], %17 {strides = array<i32>} : memref<16x32xf32, #tpu.memory_space<vmem>>, vector<16x32xf32>,
    } else {
    }
    %c0 = arith.constant 0 : index
    %c0_4 = arith.constant 0 : index
    %8 = vector.load %arg9[%c0, %c0_4] : memref<16x32xf32, #tpu.memory_space<vmem>>, vector<16x32xf32>
    %c0_5 = arith.constant 0 : index
    %c0_6 = arith.constant 0 : index
    %9 = vector.load %arg3[%c0_5, %c0_6] : memref<16x32xbf16, #tpu.memory_space<vmem>>, vector<16x32xbf16>
    %c0_7 = arith.constant 0 : index
    %c0_8 = arith.constant 0 : index
    %10 = vector.load %arg4[%c0_7, %c0_8] : memref<32x32xbf16, #tpu.memory_space<vmem>>, vector<32x32xbf16>
    %cst = arith.constant dense<0.000000e+00> : vector<16x32xf32>
    %11 = tpu.matmul %9, %10, %cst {dimension_numbers = #tpu.dot_dimension_numbers<[1], [0], [0], [1], [0, 0, 1, 1], [], []>} : vector<16x32xbf16>, vector<32x32xbf16>, vector<16x32xf32> -> vector<16x32xf32>
    %12 = arith.addf %8, %11 : vector<16x32xf32>
    %c0_9 = arith.constant 0 : index
    %c0_10 = arith.constant 0 : index
    %13 = vector.load %arg9[%c0_9, %c0_10] : memref<16x32xf32, #tpu.memory_space<vmem>>, vector<16x32xf32>
    tpu.vector_store %arg9[%c0_9, %c0_10], %12 {strides = array<i32>} : memref<16x32xf32, #tpu.memory_space<vmem>>, vector<16x32xf32>,
    %c0_i32_11 = arith.constant 0 : i32
    %14 = arith.cmpi eq, %arg2, %c0_i32_11 : i32
    %15 = arith.extui %14 : i1 to i32
    %c0_i32_12 = arith.constant 0 : i32
    %16 = arith.cmpi ne, %15, %c0_i32_12 : i32
    scf.if %16 {
      %c0_13 = arith.constant 0 : index
      %c0_14 = arith.constant 0 : index
      %17 = vector.load %arg9[%c0_13, %c0_14] : memref<16x32xf32, #tpu.memory_space<vmem>>, vector<16x32xf32>
      %c0_15 = arith.constant 0 : index
      %c0_16 = arith.constant 0 : index
      %18 = vector.load %arg5[%c0_15, %c0_16] : memref<1x32xf32, #tpu.memory_space<vmem>>, vector<1x32xf32>
      %19 = vector.broadcast %18 : vector<1x32xf32> to vector<16x32xf32>
      %20 = arith.addf %17, %19 : vector<16x32xf32>
      %21 = math.tanh %20 : vector<16x32xf32>
      %c0_17 = arith.constant 0 : index
      %c0_18 = arith.constant 0 : index
      %22 = vector.load %arg8[%c0_17, %c0_18] : memref<16x1xf32, #tpu.memory_space<vmem>>, vector<16x1xf32>
      %c0_19 = arith.constant 0 : index
      %c0_20 = arith.constant 0 : index
      %23 = vector.load %arg6[%c0_19, %c0_20] : memref<1x32xf32, #tpu.memory_space<vmem>>, vector<1x32xf32>
      %24 = vector.broadcast %23 : vector<1x32xf32> to vector<16x32xf32>
      %25 = arith.mulf %21, %24 : vector<16x32xf32>
      %cst_21 = arith.constant dense<0.000000e+00> : vector<16xf32>
      %26 = vector.multi_reduction <add>, %25, %cst_21 [1] : vector<16x32xf32> to vector<16xf32>
      %27 = vector.shape_cast %26 : vector<16xf32> to vector<16x1xf32>
      %28 = arith.addf %22, %27 : vector<16x1xf32>
      %c0_22 = arith.constant 0 : index
      %c0_23 = arith.constant 0 : index
      %29 = vector.load %arg8[%c0_22, %c0_23] : memref<16x1xf32, #tpu.memory_space<vmem>>, vector<16x1xf32>
      tpu.vector_store %arg8[%c0_22, %c0_23], %28 {strides = array<i32>} : memref<16x1xf32, #tpu.memory_space<vmem>>, vector<16x1xf32>,
    } else {
    }
    return
  }
  func.func @transform_0(%arg0: i32, %arg1: i32, %arg2: i32) -> (i32, i32) {
    %c0_i32 = arith.constant 0 : i32
    return %arg0, %arg2 : i32, i32
  }
  func.func @transform_1(%arg0: i32, %arg1: i32, %arg2: i32) -> (i32, i32) {
    %c0_i32 = arith.constant 0 : i32
    return %arg2, %arg1 : i32, i32
  }
  func.func @transform_2(%arg0: i32, %arg1: i32, %arg2: i32) -> (i32, i32) {
    %c0_i32 = arith.constant 0 : i32
    %c0_i32_0 = arith.constant 0 : i32
    return %c0_i32, %arg1 : i32, i32
  }
  func.func @transform_3(%arg0: i32, %arg1: i32, %arg2: i32) -> (i32, i32) {
    %c0_i32 = arith.constant 0 : i32
    %c0_i32_0 = arith.constant 0 : i32
    return %c0_i32, %arg1 : i32, i32
  }
  func.func @transform_4(%arg0: i32, %arg1: i32, %arg2: i32) -> i32 {
    %c0_i32 = arith.constant 0 : i32
    %c0_i32_0 = arith.constant 0 : i32
    return %c0_i32 : i32
  }
  func.func @transform_5(%arg0: i32, %arg1: i32, %arg2: i32) -> (i32, i32) {
    %c0_i32 = arith.constant 0 : i32
    %c0_i32_0 = arith.constant 0 : i32
    return %arg0, %c0_i32 : i32, i32
  }
}

</mosaic_0001>

<bundles_post_ra>
// kernel: tpu_custom_call.1
= control target key start
LH: loop header
LB: loop body
LE: loop exit
PB: predicated region body
PF: predicated region fallthrough
CT: control target
= control target key end

     0   :  { %11 = vsyncpa [#allocation5], 0  ;;  %s362_s0 = inlined_call_operand.hbm [shape: bf16[16,32], index: 0, kind: input, shape index: {}]   ;;  %s363_s1 = inlined_call_operand.hbm [shape: bf16[32,32], index: 1, kind: input, shape index: {}]   ;;  %s364_s2 = inlined_call_operand.vmem [shape: f32[1,32], index: 2, kind: input, shape index: {}]   ;;  %s365_s3 = inlined_call_operand.vmem [shape: f32[1,32], index: 3, kind: input, shape index: {}]   ;;  %s366_s4 = inlined_call_operand.<no memory space> [shape: f32[1], index: 4, kind: input, shape index: {}]   ;;  %s367_s5 = inlined_call_operand.vmem [shape: f32[16,1], index: 5, kind: output, shape index: {}]  }
   0x1   :  { %12 = vsyncpa [#allocation7], 0  ;;  %s264_s18 = smov [#allocation4]   ;;  %s216_s22 = scalar_lea.hbm %s362_s0, 128 }
   0x2   :  { %s18_s19 = sshll.u32 %s264_s18, 4  ;;  %p217_p0 = scmp.ne.s32.totalorder %s362_s0, %s216_s22  ;;  %s19_s19 = int_to_ptr.vmem [resolvable:$true] %s18_s19 }
   0x3   :  { %p220_p1 = scmp.lt.u32.totalorder %s216_s22, %s362_s0 }
   0x5   :  { %p222_p2 = pnand %p220_p1, %p217_p0 }
   0x7   :  { %225 = shalt.err (!%p222_p2)
}
   0x8   :  { %s226_s27 = scalar_lea.vmem %s19_s19, 128  ;;  %p231_p4 = scmp.lt.s32.totalorder %s19_s19, %s19_s19 }
   0x9   :  { %p227_p3 = scmp.ne.s32.totalorder %s19_s19, %s226_s27  ;;  %p232_p5 = scmp.lt.s32.totalorder %s226_s27, %s226_s27 }
   0xb   :  { %p233_p6 = por %p232_p5, %p231_p4 }
   0xd   :  { %p234_p7 = pnand %p233_p6, %p227_p3 }
   0xf   :  { %237 = shalt.err (!%p234_p7)
}
  0x10   :  { %s265_s28 = smov 64   ;;  %s266_s29 = smov 4  }
  0x11   :  { %24 = dma.hbm_to_vmem [thread:$0]  %s362_s0, 128, %s19_s19, [#allocation5], %s265_s28, %s265_s28, %s266_s29  }
  0x12   :  { %s267_s7 = smov [#allocation6]   ;;  %s238_s11 = scalar_lea.hbm %s363_s1, 256 }
  0x13   :  { %s30_s8 = sshll.u32 %s267_s7, 4  ;;  %p239_p8 = scmp.ne.s32.totalorder %s363_s1, %s238_s11  ;;  %s31_s8 = int_to_ptr.vmem [resolvable:$true] %s30_s8 }
  0x14   :  { %p242_p9 = scmp.lt.u32.totalorder %s238_s11, %s363_s1 }
  0x16   :  { %p244_p10 = pnand %p242_p9, %p239_p8 }
  0x18   :  { %247 = shalt.err (!%p244_p10)
}
  0x19   :  { %s248_s16 = scalar_lea.vmem %s31_s8, 256  ;;  %p253_p12 = scmp.lt.s32.totalorder %s31_s8, %s31_s8 }
  0x1a   :  { %p249_p11 = scmp.ne.s32.totalorder %s31_s8, %s248_s16  ;;  %p254_p13 = scmp.lt.s32.totalorder %s248_s16, %s248_s16 }
  0x1c   :  { %p255_p0 = por %p254_p13, %p253_p12 }
  0x1e   :  { %p256_p1 = pnand %p255_p0, %p249_p11 }
  0x20   :  { %259 = shalt.err (!%p256_p1)
}
  0x21   :  { %36 = dma.hbm_to_vmem [thread:$0]  %s363_s1, 256, %s31_s8, [#allocation7], %s265_s28, %s265_s28, %s266_s29  }
  0x22   :  { %260 = dma.done.wait [#allocation5], 128  }
  0x23   :  { %261 = vsyncadd [#allocation5], 4294967168 }
  0x24   :  { %262 = dma.done.wait [#allocation7], 256  }
  0x25   :  { %263 = vsyncadd [#allocation7], 4294967040  ;;  %vm65_vm0 = vcmask 261120   ;;  %v268_v0 = vmov 0.0   ;;  %vm269_vm1 = vmmov 0   ;;  %v209_v1 = vld [vmem:[#allocation6] sm:$0xff]   ;;  %v57_v4 = vstv %s366_s4 }
  0x26   :  { %195 = vmatprep.subr.bf16.mxu0 %v268_v0  ;;  %199 = vmatprep.mubr.msk.bf16.mxu0 %vm269_vm1, %v268_v0  ;;  %66 = vst.msk [vmem:[#allocation2] sm:$0xff] %vm65_vm0, %v268_v0  ;;  %67 = vst.msk [vmem:[#allocation2 + $0x8] sm:$0xff] %vm65_vm0, %v268_v0  ;;  %v210_v2 = vld [vmem:[#allocation6 + $0x8] sm:$0xff]   ;;  %v211_v3 = vld [vmem:[#allocation4] sm:$0xff]   ;;  %vm59_vm2 = vcmask 7168  }
  0x27   :  { %196 = vmatpush3.bf16.msra.mxu0 %v209_v1  ;;  %60 = vst.msk [vmem:[%s367_s5] sm:$0xff] %vm59_vm2, %v57_v4  ;;  %61 = vst.msk [vmem:[%s367_s5 + $0x8] sm:$0xff] %vm59_vm2, %v57_v4  ;;  %v190_v13 = vld [vmem:[%s364_s2] ss:$0 sm:$0xff] }
  0x28   :  { %197 = vmatprep.subr.bf16.mxu0 %v268_v0  ;;  %v191_v18 = vld [vmem:[%s365_s3] ss:$0 sm:$0xff] }
  0x2b   :  { %198 = vmatpush3.bf16.msra.mxu0 %v210_v2 }
  0x2d   :  { %v68_v5 = vld [vmem:[#allocation2] sm:$0xff]  ;;  %v69_v7 = vld [vmem:[#allocation2 + $0x8] sm:$0xff] }
  0x2e   :  { %200 = vmatmul.mubr.msk.bf16.vlgmr.msra.gmra.mrb[0].mxu0 %vm65_vm0, %v211_v3  ;;  %v158_v25 = vld [vmem:[%s367_s5] sm:$0xff]  ;;  %v159_v28 = vld [vmem:[%s367_s5 + $0x8] sm:$0xff] }
 0x101   :  { %v131_v6 = vpop.f32.mrb[0].mxu0 }
 0x102   :  { %v138_v8 = vadd.f32 %v131_v6, %v68_v5  ;;  %v201_v9 = vpop.f32.mrb[1].mxu0 }
 0x103   :  { %v134_v10 = vpop.f32.mrb[2].mxu0 }
 0x104   :  { %140 = vst.msk [vmem:[#allocation2] sm:$0xff] %vm65_vm0, %v138_v8  ;;  %v139_v11 = vadd.f32 %v134_v10, %v69_v7  ;;  %v202_v12 = vpop.f32.mrb[3].mxu0 }
 0x106   :  { %141 = vst.msk [vmem:[#allocation2 + $0x8] sm:$0xff] %vm65_vm0, %v139_v11 }
 0x10b   :  { %v145_v14 = vld [vmem:[#allocation2] sm:$0xff] }
 0x10c   :  { %v154_v15 = vadd.f32 %v190_v13, %v145_v14 }
 0x10d   :  { %v146_v16 = vld [vmem:[#allocation2 + $0x8] sm:$0xff] }
 0x10e   :  { %212 = vtanh.f32 %v154_v15  ;;  %v155_v17 = vadd.f32 %v190_v13, %v146_v16 }
 0x110   :  { %214 = vtanh.f32 %v155_v17 }
 0x118   :  { %v213_v19 = vpop.eup %212 }
 0x119   :  { %v167_v20 = vmul.f32 %v213_v19, %v191_v18 }
 0x11a   :  { %v215_v21 = vpop.eup %214 }
 0x11b   :  { %v169_v22 = vsel %vm65_vm0, %v167_v20, 0.0  ;;  %v168_v23 = vmul.f32 %v215_v21, %v191_v18 }
 0x11c   :  { %170 = vadd.xlane.f32.xlu0 %v169_v22 }
 0x11d   :  { %v172_v24 = vsel %vm65_vm0, %v168_v23, 0.0 }
 0x120   :  { %173 = vadd.xlane.f32.xlu0 %v172_v24 }
 0x1a9   :  { %v171_v26 = vpop.xlane.xlu0 %170 }
 0x1aa   :  { %v175_v27 = vadd.f32 %v171_v26, %v158_v25 }
 0x1ac   :  { %178 = vst.msk [vmem:[%s367_s5] sm:$0xff] %vm59_vm2, %v175_v27 }
 0x1ad   :  { %v174_v29 = vpop.xlane.xlu0 %173 }
 0x1ae   :  { %v176_v30 = vadd.f32 %v174_v29, %v159_v28 }
 0x1b0   :  { %179 = vst.msk [vmem:[%s367_s5 + $0x8] sm:$0xff] %vm59_vm2, %v176_v30 }
 0x1b1   :  { %184 = vsyncpa [#allocation5], 1 }
 0x1b2   :  { %185 = vsyncpa [#allocation7], 1 }

</bundles_post_ra>
